<compile_context>
chip_gen: v7x
topology: tpu7x:2x2x1
jax: 0.10.0
libtpu: 0.0.40
codegen_flags: <defaults>
</compile_context>

<pallas_src>
import functools

import jax
import jax.numpy as jnp
from jax.experimental import pallas as pl
from jax.experimental.pallas import tpu as pltpu

_TRANSCENDENTAL = ("tanh", "gelu", "sigmoid")


def _chip_has_bf16_vpu() -> bool:
    """True on chips with bf16 VPU/EUP (v6e, v7x); False on v5e and older."""
    try:
        kind = jax.devices()[0].device_kind.lower()
    except Exception:
        return False
    return not any(tag in kind for tag in ("v2", "v3", "v4", "v5"))


def _apply_activation(x, activation: str, *, bf16_native: bool):
    if activation == "relu":
        return jax.nn.relu(x)
    if activation not in _TRANSCENDENTAL:
        raise ValueError("Activation function not supported")

    # Compute dtype for transcendental paths:
    #  * f32/f64 stay as-is.
    #  * bf16 stays bf16 on v6e/v7x (bf16 VPU/EUP); upcast to f32 on v5e.
    #  * f16 always upcasts to f32 (spottier low-precision lowering support).
    if x.dtype == jnp.bfloat16:
        compute_dtype = jnp.bfloat16 if bf16_native else jnp.float32
    elif x.dtype == jnp.float16:
        compute_dtype = jnp.float32
    else:
        compute_dtype = x.dtype
    xf = x.astype(compute_dtype)

    if activation == "tanh":
        y = jnp.tanh(xf)
    elif activation == "gelu":
        # nn.GELU() default = exact (erf-based) GELU, matching PyTorch.
        y = xf * 0.5 * (1.0 + jax.lax.erf(xf * 0.7071067811865476))
    else:  # sigmoid
        y = jax.nn.sigmoid(xf)

    return y.astype(x.dtype)


def _activation_kernel(x_ref, o_ref, *, activation: str, bf16_native: bool):
    # Pure elementwise hot path: VPU/EUP on a lane-dense VMEM tile.
    o_ref[...] = _apply_activation(x_ref[...], activation, bf16_native=bf16_native)


def activation_function(
    x,
    activation: str,
    *,
    block_bytes: int = 4 * 1024 * 1024,
    donate_input: bool = False,
):
    """JAX/Pallas equivalent of ActivationFunction(activation)(x)."""
    if activation not in ("relu",) + _TRANSCENDENTAL:
        raise ValueError("Activation function not supported")

    orig_shape = x.shape
    orig_dtype = x.dtype
    total = int(x.size)
    if total == 0:
        return x

    if activation in _TRANSCENDENTAL and not jnp.issubdtype(orig_dtype, jnp.floating):
        # Silent truncation back to an integer dtype would be wrong; reject.
        raise ValueError(f"'{activation}' requires a floating-point input dtype")

    itemsize = jnp.dtype(orig_dtype).itemsize
    # Sublane packing alignment: 8 rows (f32), 16 (bf16/f16), 32 (int8).
    row_align = max(8, 32 // max(itemsize, 1))

    # Lane-dense width: largest multiple of 128 that divides total -> no pad.
    lane = None
    for cand in (512, 384, 256, 128):
        if total % cand == 0:
            lane = cand
            break

    flat = x.reshape(-1)
    padded = False
    if lane is None:
        # Ragged element count (total % 128 != 0): fall back to a 128-lane pad.
        lane = 128
        padded_total = pl.cdiv(total, lane) * lane
        flat = jnp.pad(flat, (0, padded_total - total))
        padded = True
    else:
        padded_total = total

    rows = padded_total // lane
    x2d = flat.reshape(rows, lane)

    # Row tile: ~block_bytes budget, rounded down to sublane alignment, then
    # capped so the grid has >= ~4 steps when rows allows (pipeline overlap).
    bm_budget = max(
        row_align, (block_bytes // (lane * itemsize)) // row_align * row_align
    )
    bm_quarter = (rows // 4) // row_align * row_align
    if bm_quarter >= row_align:
        bm_budget = min(bm_budget, bm_quarter)
    block_m = min(rows, bm_budget)

    grid = (pl.cdiv(rows, block_m),)

    bf16_native = _chip_has_bf16_vpu()
    kernel = functools.partial(
        _activation_kernel, activation=activation, bf16_native=bf16_native
    )

    transcendentals = total if activation in _TRANSCENDENTAL else 0
    cost = pl.CostEstimate(
        flops=total,
        transcendentals=transcendentals,
        bytes_accessed=2 * total * itemsize,
    )

    # Aliasing only valid when the 2-D view maps 1:1 onto the input buffer.
    aliases = {0: 0} if (donate_input and not padded) else {}

    out2d = pl.pallas_call(
        kernel,
        out_shape=jax.ShapeDtypeStruct((rows, lane), orig_dtype),
        grid=grid,
        in_specs=[pl.BlockSpec((block_m, lane), lambda i: (i, 0))],
        out_specs=pl.BlockSpec((block_m, lane), lambda i: (i, 0)),
        compiler_params=pltpu.CompilerParams(
            # "parallel" lets Mosaic shard the streaming axis across both
            # TensorCores on v7x; no-op on single-TC v5e / v6e.
            dimension_semantics=("parallel",),
            vmem_limit_bytes=32 * 1024 * 1024,
        ),
        cost_estimate=cost,
        input_output_aliases=aliases,
    )(x2d)

    out = out2d.reshape(-1)
    if padded:
        out = out[:total]
    return out.reshape(orig_shape)


def _reference(x, activation: str):
    # Pure-JAX reference for correctness check (matches PyTorch defaults).
    if activation == "relu":
        return jax.nn.relu(x)
    if activation == "tanh":
        return jnp.tanh(x)
    if activation == "gelu":
        return x * 0.5 * (1.0 + jax.lax.erf(x * 0.7071067811865476))
    if activation == "sigmoid":
        return jax.nn.sigmoid(x)
    raise ValueError("Activation function not supported")


if __name__ == "__main__":
    key = jax.random.PRNGKey(0)
    # Shape consistent with an NCHW conv activation: batch=2, channels=4, 16x16.
    x = jax.random.normal(key, (2, 4, 16, 16), dtype=jnp.float32)

    ok = True
    for act in ("tanh", "relu", "gelu", "sigmoid"):
        y = activation_function(x, act)
        y = jax.block_until_ready(y)
        y_ref = _reference(x, act)
        if y.shape != x.shape or y.dtype != x.dtype:
            ok = False
            break
        if not jnp.allclose(y, y_ref, atol=1e-5, rtol=1e-5):
            ok = False
            break

    if ok:
        print("KERNEL_OK")
    else:
        print("KERNEL_MISMATCH")
</pallas_src>

<mosaic_0001>
module attributes {stable_mosaic.version = 11 : i64} {
  func.func @_activation_kernel(%arg0: i32, %arg1: memref<4x512xf32, #tpu.memory_space<vmem>>, %arg2: memref<4x512xf32, #tpu.memory_space<vmem>>) attributes {dimension_semantics = [#tpu.dimension_semantics<parallel>], iteration_bounds = array<i64: 1>, scalar_prefetch = 0 : i64, scratch_operands = 0 : i64, tpu.core_type = #tpu.core_type<tc>, window_params = [{transform_indices = @transform_0, window_bounds = array<i64: 4, 512>}, {transform_indices = @transform_1, window_bounds = array<i64: 4, 512>}]} {
    %c0 = arith.constant 0 : index
    %c0_0 = arith.constant 0 : index
    %0 = vector.load %arg1[%c0, %c0_0] : memref<4x512xf32, #tpu.memory_space<vmem>>, vector<4x512xf32>
    %1 = math.tanh %0 : vector<4x512xf32>
    %c0_1 = arith.constant 0 : index
    %c0_2 = arith.constant 0 : index
    %2 = vector.load %arg2[%c0_1, %c0_2] : memref<4x512xf32, #tpu.memory_space<vmem>>, vector<4x512xf32>
    tpu.vector_store %arg2[%c0_1, %c0_2], %1 {strides = array<i32>} : memref<4x512xf32, #tpu.memory_space<vmem>>, vector<4x512xf32>,
    return
  }
  func.func @transform_0(%arg0: i32) -> (i32, i32) {
    %c0_i32 = arith.constant 0 : i32
    %c0_i32_0 = arith.constant 0 : i32
    return %arg0, %c0_i32 : i32, i32
  }
  func.func @transform_1(%arg0: i32) -> (i32, i32) {
    %c0_i32 = arith.constant 0 : i32
    %c0_i32_0 = arith.constant 0 : i32
    return %arg0, %c0_i32 : i32, i32
  }
}

</mosaic_0001>

<bundles_post_ra>
// kernel: tpu_custom_call.1
= control target key start
LH: loop header
LB: loop body
LE: loop exit
PB: predicated region body
PF: predicated region fallthrough
CT: control target
= control target key end

     0   :  { %6 = vsyncpa [#allocation3], 0  ;;  %s132_s0 = inlined_call_operand.hbm [shape: f32[4,512], index: 0, kind: input, shape index: {}]   ;;  %s133_s1 = inlined_call_operand.hbm [shape: f32[4,512], index: 1, kind: output, shape index: {}]  }
   0x1   :  { %7 = vsyncpa [#allocation4], 0  ;;  %s96_s6 = smov [#allocation2]   ;;  %s48_s10 = scalar_lea.hbm %s132_s0, 256 }
   0x2   :  { %s14_s7 = sshll.u32 %s96_s6, 4  ;;  %p49_p0 = scmp.ne.s32.totalorder %s132_s0, %s48_s10  ;;  %s15_s7 = int_to_ptr.vmem [resolvable:$true] %s14_s7 }
   0x3   :  { %p52_p1 = scmp.lt.u32.totalorder %s48_s10, %s132_s0 }
   0x5   :  { %p54_p2 = pnand %p52_p1, %p49_p0 }
   0x7   :  { %57 = shalt.err (!%p54_p2)
}
   0x8   :  { %s58_s15 = scalar_lea.vmem %s15_s7, 256  ;;  %p63_p4 = scmp.lt.s32.totalorder %s15_s7, %s15_s7 }
   0x9   :  { %p59_p3 = scmp.ne.s32.totalorder %s15_s7, %s58_s15  ;;  %p64_p5 = scmp.lt.s32.totalorder %s58_s15, %s58_s15 }
   0xb   :  { %p65_p6 = por %p64_p5, %p63_p4 }
   0xd   :  { %p66_p7 = pnand %p65_p6, %p59_p3 }
   0xf   :  { %69 = shalt.err (!%p66_p7)
}
  0x10   :  { %17 = dma.hbm_to_vmem [thread:$0]  %s132_s0, 256, %s15_s7, [#allocation3]  }
  0x11   :  { %92 = dma.done.wait [#allocation3], 256  }
  0x12   :  { %93 = vsyncadd [#allocation3], 4294967040  ;;  %v21_v0 = vld [vmem:[#allocation2] sm:$0xff]  ;;  %v22_v1 = vld [vmem:[#allocation2 + $0x8] sm:$0xff]  ;;  %s97_s18 = smov [#allocation5]  }
  0x13   :  { %44 = vtanh.f32 %v21_v0  ;;  %s33_s19 = sshll.u32 %s97_s18, 4  ;;  %s34_s19 = int_to_ptr.vmem [resolvable:$true] %s33_s19 }
  0x14   :  { %46 = vtanh.f32 %v22_v1  ;;  %s70_s20 = scalar_lea.vmem %s34_s19, 256  ;;  %p75_p9 = scmp.lt.s32.totalorder %s34_s19, %s34_s19 }
  0x15   :  { %p71_p8 = scmp.ne.s32.totalorder %s34_s19, %s70_s20  ;;  %p76_p10 = scmp.lt.s32.totalorder %s70_s20, %s70_s20 }
  0x17   :  { %p77_p11 = por %p76_p10, %p75_p9 }
  0x19   :  { %p78_p12 = pnand %p77_p11, %p71_p8 }
  0x1d   :  { %v45_v2 = vpop.eup %44 }
  0x1e   :  { %v47_v3 = vpop.eup %46  ;;  %25 = vst [vmem:[#allocation5] sm:$0xff] %v45_v2 }
  0x1f   :  { %26 = vst [vmem:[#allocation5 + $0x8] sm:$0xff] %v47_v3 }
  0x20   :  { %81 = shalt.err (!%p78_p12)
}
  0x21   :  { %s82_s22 = scalar_lea.hbm %s133_s1, 256 }
  0x22   :  { %p83_p13 = scmp.ne.s32.totalorder %s133_s1, %s82_s22  ;;  %p86_p0 = scmp.lt.u32.totalorder %s82_s22, %s133_s1 }
  0x24   :  { %p88_p1 = pnand %p86_p0, %p83_p13 }
  0x26   :  { %91 = shalt.err (!%p88_p1)
}
  0x27   :  { %36 = dma.vmem_to_hbm [thread:$0]  %s34_s19, 256, %s133_s1, [#allocation4]  }
  0x28   :  { %94 = dma.done.wait [#allocation4], 256  }
  0x29   :  { %95 = vsyncadd [#allocation4], 4294967040 }
  0x2a   :  { %40 = vsyncpa [#allocation3], 1 }
  0x2b   :  { %41 = vsyncpa [#allocation4], 1 }

</bundles_post_ra>
